<compile_context>
chip_gen: v7x
topology: tpu7x:2x2x1
jax: 0.10.0
libtpu: 0.0.40
codegen_flags: <defaults>
</compile_context>

<pallas_src>
import functools

import numpy as np

import jax
import jax.numpy as jnp
from jax import lax
from jax.experimental import pallas as pl
from jax.experimental.pallas import tpu as pltpu

_BN_EPS = 1e-5
_HALO = 2          # spatial halo of every canvas (covers dilation<=2)
_C0 = 65           # real input channels (32 left + 32 warp + 1 disp)
_C0_PAD = 128      # padded input channel count (lane/sublane friendly)


# ----------------------------------------------------------------------------
# Layer table (PyTorch layout) and parameter init
# ----------------------------------------------------------------------------
_LAYER_DEFS = {
    # name: (cin, cout, k, bn, transposed)
    "conv5": (65, 32, 3, True, False),
    "conv6": (32, 64, 3, True, False),
    "conv7": (64, 32, 3, True, False),
    "conv8": (64, 32, 3, True, False),
    "conv10": (128, 64, 3, True, False),
    "conv11": (64, 128, 3, True, False),
    "conv12": (128, 32, 3, True, False),
    "conv13": (128, 32, 3, True, False),
    "conv15": (192, 32, 3, True, False),
    "conv16": (192, 32, 3, True, False),
    "conv18": (256, 128, 3, True, False),
    "conv19": (128, 256, 3, True, False),
    "conv20": (256, 32, 3, True, False),
    "conv21": (256, 32, 3, True, False),
    "conv23": (320, 32, 3, True, False),
    "conv24": (320, 32, 3, True, False),
    "conv26": (384, 32, 3, True, False),
    "conv27": (384, 32, 3, True, False),
    "conv29": (448, 32, 3, True, False),
    "conv30": (448, 32, 3, True, False),
    "conv32": (512, 256, 3, True, False),
    "conv33": (256, 128, 3, True, True),
    "conv34": (128, 128, 3, True, False),
    "conv36": (256, 64, 3, True, True),
    "conv37": (64, 64, 3, True, False),
    "conv39": (128, 32, 3, True, True),
    "conv40": (32, 32, 3, True, False),
    "conv41": (32, 1, 1, False, False),
}


def _init_layer(key, cin, cout, k, bn=True, transposed=False):
    k1, k2, k3, k4, k5 = jax.random.split(key, 5)
    if transposed:
        w = jax.random.normal(k1, (cin, cout, k, k), jnp.float32) * 0.05
    else:
        w = jax.random.normal(k1, (cout, cin, k, k), jnp.float32) * 0.05
    p = {"w": w}
    if bn:
        p["gamma"] = 1.0 + 0.1 * jax.random.normal(k2, (cout,), jnp.float32)
        p["beta"] = 0.1 * jax.random.normal(k3, (cout,), jnp.float32)
        p["mean"] = 0.1 * jax.random.normal(k4, (cout,), jnp.float32)
        p["var"] = 0.5 + jax.random.uniform(k5, (cout,), jnp.float32)
    return p


def init_params(key):
    params = {}
    keys = jax.random.split(key, len(_LAYER_DEFS))
    for sub, (name, (cin, cout, k, bn, tr)) in zip(keys, _LAYER_DEFS.items()):
        params[name] = _init_layer(sub, cin, cout, k, bn=bn, transposed=tr)
    return params


# ----------------------------------------------------------------------------
# Weight folding / packing and geometry constants (hoisted, one-time)
# ----------------------------------------------------------------------------
def _fold_bn(p, cout):
    if "gamma" in p:
        scale = p["gamma"] * lax.rsqrt(p["var"] + _BN_EPS)
        shift = p["beta"] - p["mean"] * scale
    else:
        scale = jnp.ones((cout,), jnp.float32)
        shift = jnp.zeros((cout,), jnp.float32)
    return scale, shift


def _pack_conv(p, transposed):
    """Fold BN and pack weights as (Cin, k*k*Cout) bf16 (tap-major columns)."""
    w = p["w"]
    if transposed:
        cin, cout, ks, _ = w.shape
        # ConvT(k=3,s=2,p=1,op=1) == same-pad conv on the zero-dilated input
        # with the spatially flipped kernel.
        wt = jnp.transpose(w, (2, 3, 0, 1))[::-1, ::-1]          # (k,k,Cin,Cout)
    else:
        cout, cin, ks, _ = w.shape
        wt = jnp.transpose(w, (2, 3, 1, 0))                       # (k,k,Cin,Cout)
    scale, shift = _fold_bn(p, cout)
    wt = wt * scale
    wflat = jnp.transpose(wt.reshape(ks * ks, cin, cout), (1, 0, 2))
    wflat = wflat.reshape(cin, ks * ks * cout)
    return wflat.astype(jnp.bfloat16), shift.reshape(1, cout).astype(jnp.float32)


def _interior_mask(batch, h, w):
    hp, wp = h + 2 * _HALO, w + 2 * _HALO
    m = np.zeros((batch, hp, wp, 1), np.float32)
    m[:, _HALO:_HALO + h, _HALO:_HALO + w, :] = 1.0
    return jnp.asarray(m.reshape(batch * hp * wp, 1))


def _down_matrix(batch, h, w):
    """0/1 matrix selecting even interior pixels of an (h,w) canvas into the
    (h//2, w//2) canvas interior (stride-2 decimation, halo re-zeroed)."""
    hp_i, wp_i = h + 2 * _HALO, w + 2 * _HALO
    ho, wo = h // 2, w // 2
    hp_o, wp_o = ho + 2 * _HALO, wo + 2 * _HALO
    mat = np.zeros((batch * hp_o * wp_o, batch * hp_i * wp_i), np.float32)
    for b in range(batch):
        for yo in range(ho):
            for xo in range(wo):
                po = b * hp_o * wp_o + (yo + _HALO) * wp_o + (xo + _HALO)
                pi = b * hp_i * wp_i + (2 * yo + _HALO) * wp_i + (2 * xo + _HALO)
                mat[po, pi] = 1.0
    return jnp.asarray(mat, jnp.bfloat16)


def _up_matrix(batch, h, w):
    """0/1 matrix placing an (h,w) canvas interior at the even positions of
    the (2h,2w) canvas interior (zero-dilated upsampling for ConvTranspose)."""
    hp_i, wp_i = h + 2 * _HALO, w + 2 * _HALO
    ho, wo = 2 * h, 2 * w
    hp_o, wp_o = ho + 2 * _HALO, wo + 2 * _HALO
    mat = np.zeros((batch * hp_o * wp_o, batch * hp_i * wp_i), np.float32)
    for b in range(batch):
        for yi in range(h):
            for xi in range(w):
                po = b * hp_o * wp_o + (2 * yi + _HALO) * wp_o + (2 * xi + _HALO)
                pi = b * hp_i * wp_i + (yi + _HALO) * wp_i + (xi + _HALO)
                mat[po, pi] = 1.0
    return jnp.asarray(mat, jnp.bfloat16)


def prepare_kernel_constants(params, batch, h, w):
    """Fold BN, pack all weights, build resample matrices and halo masks."""
    consts = {}
    for name, (cin, cout, ks, bn, tr) in _LAYER_DEFS.items():
        wflat, bias = _pack_conv(params[name], tr)
        if name == "conv5":
            wflat = jnp.pad(wflat, ((0, _C0_PAD - cin), (0, 0)))
        if name == "conv41":
            # pad N to 128 lanes so the final 1x1 matmul is lane-dense
            wflat = jnp.pad(wflat, ((0, 0), (0, 128 - wflat.shape[1])))
        consts[name + "_w"] = wflat
        if bn:
            consts[name + "_b"] = bias
    consts["m0"] = _interior_mask(batch, h, w)
    consts["m1"] = _interior_mask(batch, h // 2, w // 2)
    consts["m2"] = _interior_mask(batch, h // 4, w // 4)
    consts["m3"] = _interior_mask(batch, h // 8, w // 8)
    consts["S01"] = _down_matrix(batch, h, w)
    consts["S12"] = _down_matrix(batch, h // 2, w // 2)
    consts["S23"] = _down_matrix(batch, h // 4, w // 4)
    consts["U32"] = _up_matrix(batch, h // 8, w // 8)
    consts["U21"] = _up_matrix(batch, h // 4, w // 4)
    consts["U10"] = _up_matrix(batch, h // 2, w // 2)
    names = sorted(consts.keys())
    return names, [consts[n] for n in names]


# ----------------------------------------------------------------------------
# Determine pltpu.roll direction convention once (hardware probe)
# ----------------------------------------------------------------------------
def _detect_roll_sign():
    x_np = np.arange(8 * 128, dtype=np.float32).reshape(8, 128)

    def probe(x_ref, o_ref):
        o_ref[...] = pltpu.roll(x_ref[...], 1, axis=0)

    y = pl.pallas_call(
        probe, out_shape=jax.ShapeDtypeStruct((8, 128), jnp.float32)
    )(jnp.asarray(x_np))
    y_np = np.asarray(jax.device_get(y))
    if np.array_equal(y_np, np.roll(x_np, 1, axis=0)):
        return -1          # out[i] = in[i - s]  ->  use s = -offset
    if np.array_equal(y_np, np.roll(x_np, -1, axis=0)):
        return 1           # out[i] = in[i + s]  ->  use s = +offset
    raise RuntimeError("Unexpected pltpu.roll semantics")


# ----------------------------------------------------------------------------
# Fused forward (single pallas_call for the whole network)
# ----------------------------------------------------------------------------
def make_forward(cfg, names, batch, H, W, roll_sign):
    norm = float(cfg["initial_disp"] + cfg["max_action"] * cfg["max_iteration"])
    max_action = float(cfg["max_action"])
    cidx = {n: i for i, n in enumerate(names)}
    Hp, Wp = H + 2 * _HALO, W + 2 * _HALO
    # stage s -> (row stride Wp_s, flattened canvas rows M_s)
    stage = {}
    for s in range(4):
        hs, ws = H >> s, W >> s
        stage[s] = (ws + 2 * _HALO, batch * (hs + 2 * _HALO) * (ws + 2 * _HALO))
    M0 = stage[0][1]

    def kernel(*args):
        refs = args[:-1]
        o_ref = args[-1]

        def cref(name):
            return refs[1 + cidx[name]]

        def conv(parts, name, s, mask, dil=1):
            """3x3 conv (+folded BN + ReLU) on a flattened canvas.
            parts: list of bf16 (M, Ck) component activations (channel concat
            is handled by K-slicing the packed weight)."""
            wp, m = stage[s]
            w = cref(name + "_w")[...]
            b = cref(name + "_b")[...]
            cout = b.shape[-1]
            # one lane-dense matmul covering all 9 taps
            taps = None
            row0 = 0
            for part in parts:
                ck = part.shape[-1]
                c = jnp.dot(part, w[row0:row0 + ck, :],
                            preferred_element_type=jnp.float32)
                taps = c if taps is None else taps + c
                row0 += ck
            # combine the nine narrow partials with sublane rolls
            acc = None
            for kh in range(3):
                for kw in range(3):
                    t = kh * 3 + kw
                    off = ((kh - 1) * wp + (kw - 1)) * dil
                    blk = taps[:, t * cout:(t + 1) * cout]
                    sh = (roll_sign * off) % m
                    if sh:
                        blk = pltpu.roll(blk, sh, axis=0)
                    acc = blk if acc is None else acc + blk
            y = jnp.maximum(acc + b, 0.0)
            return (y * mask).astype(jnp.bfloat16)

        def resample(mat, x):
            # 0/1 selection matmul (stride-2 decimation or zero-dilated upsample)
            return jnp.dot(cref(mat)[...], x,
                           preferred_element_type=jnp.float32).astype(jnp.bfloat16)

        m0 = cref("m0")[...]
        m1 = cref("m1")[...]
        m2 = cref("m2")[...]
        m3 = cref("m3")[...]

        x0 = refs[0][...]                                   # (M0, 128) bf16
        # ---- encoder ----
        x5 = conv([x0], "conv5", 0, m0)
        x6 = resample("S01", conv([x5], "conv6", 0, m0))    # stride 2
        x7 = conv([x6], "conv7", 1, m1)
        x8 = conv([x6], "conv8", 1, m1, dil=2)
        x10 = conv([x6, x7, x8], "conv10", 1, m1)
        x11 = resample("S12", conv([x10], "conv11", 1, m1))  # stride 2
        x12 = conv([x11], "conv12", 2, m2)
        x13 = conv([x11], "conv13", 2, m2, dil=2)
        x14 = [x11, x12, x13]
        x15 = conv(x14, "conv15", 2, m2)
        x16 = conv(x14, "conv16", 2, m2, dil=2)
        x17 = x14 + [x15, x16]
        x18 = conv(x17, "conv18", 2, m2)
        x19 = resample("S23", conv([x18], "conv19", 2, m2))  # stride 2
        x20 = conv([x19], "conv20", 3, m3)
        x21 = conv([x19], "conv21", 3, m3, dil=2)
        x22 = [x19, x20, x21]
        x23 = conv(x22, "conv23", 3, m3)
        x24 = conv(x22, "conv24", 3, m3, dil=2)
        x25 = x22 + [x23, x24]
        x26 = conv(x25, "conv26", 3, m3)
        x27 = conv(x25, "conv27", 3, m3, dil=2)
        x28 = x25 + [x26, x27]
        x29 = conv(x28, "conv29", 3, m3)
        x30 = conv(x28, "conv30", 3, m3, dil=2)
        x31 = x28 + [x29, x30]
        x32 = conv(x31, "conv32", 3, m3)
        # ---- decoder (transposed convs via zero-dilated upsample + conv) ----
        x33 = conv([resample("U32", x32)], "conv33", 2, m2)
        x34 = conv([x33], "conv34", 2, m2)
        x36 = conv([resample("U21", x18), resample("U21", x34)], "conv36", 1, m1)
        x37 = conv([x36], "conv37", 1, m1)
        x39 = conv([resample("U10", x10), resample("U10", x37)], "conv39", 0, m0)
        x40 = conv([x39], "conv40", 0, m0)
        # conv41: 1x1, linear, bias=False  (epilogue matmul, lane-padded N)
        x41 = jnp.dot(x40, cref("conv41_w")[...],
                      preferred_element_type=jnp.float32)[:, 0:1]
        o_ref[...] = jnp.clip(x41, -max_action, max_action)

    n_inputs = 1 + len(names)
    vspec = pl.BlockSpec(memory_space=pltpu.MemorySpace.VMEM)
    fused = pl.pallas_call(
        kernel,
        out_shape=jax.ShapeDtypeStruct((M0, 1), jnp.float32),
        in_specs=[vspec] * n_inputs,
        out_specs=vspec,
        compiler_params=pltpu.CompilerParams(
            vmem_limit_bytes=48 * 1024 * 1024),
    )

    def forward(consts, left_fea, warp_fea, cur_disp_map):
        lf = jnp.transpose(left_fea, (0, 2, 3, 1))
        wf = jnp.transpose(warp_fea, (0, 2, 3, 1))
        dd = (cur_disp_map / norm)[..., None]
        x0 = jnp.concatenate([lf, wf, dd], axis=-1)                   # (B,H,W,65)
        x0 = jnp.pad(x0, ((0, 0), (_HALO, _HALO), (_HALO, _HALO),
                          (0, _C0_PAD - x0.shape[-1])))
        x0 = x0.reshape(batch * Hp * Wp, _C0_PAD).astype(jnp.bfloat16)
        out = fused(x0, *consts)                                      # (M0, 1)
        out = out.reshape(batch, Hp, Wp)[:, _HALO:_HALO + H, _HALO:_HALO + W]
        return out

    return forward


# ----------------------------------------------------------------------------
# Pure-JAX reference (lax convs, matched bf16 rounding points) for validation
# ----------------------------------------------------------------------------
def _reference_forward(params, left_fea, warp_fea, cur_disp_map, cfg):
    norm = cfg["initial_disp"] + cfg["max_action"] * cfg["max_iteration"]
    ma = cfg["max_action"]

    def conv(name, x, stride=1, dil=1, relu=True):
        p = params[name]
        w = p["w"]
        cout, _, ks, _ = w.shape
        scale, shift = _fold_bn(p, cout)
        wh = (jnp.transpose(w, (2, 3, 1, 0)) * scale).astype(jnp.bfloat16)
        pad = dil * (ks - 1) // 2
        y = lax.conv_general_dilated(
            x.astype(jnp.bfloat16), wh, (stride, stride),
            ((pad, pad), (pad, pad)), rhs_dilation=(dil, dil),
            dimension_numbers=("NHWC", "HWIO", "NHWC"),
            preferred_element_type=jnp.float32)
        y = y + shift
        return jnp.maximum(y, 0.0) if relu else y

    def convT(name, x, relu=True):
        # direct scatter definition of ConvTranspose2d(k=3, s=2, p=1, op=1)
        p = params[name]
        w = p["w"]
        cout = w.shape[1]
        scale, shift = _fold_bn(p, cout)
        wb = (w * scale[None, :, None, None]).astype(jnp.bfloat16)
        xb = x.astype(jnp.bfloat16)
        bq, hq, wq, _ = x.shape
        out = jnp.zeros((bq, 2 * hq + 2, 2 * wq + 2, cout), jnp.float32)
        for kh in range(3):
            for kw in range(3):
                c = jnp.einsum("bhwc,cd->bhwd", xb, wb[:, :, kh, kw],
                               preferred_element_type=jnp.float32)
                out = out.at[:, kh:kh + 2 * hq:2, kw:kw + 2 * wq:2, :].add(c)
        out = out[:, 1:2 * hq + 1, 1:2 * wq + 1, :] + shift
        return jnp.maximum(out, 0.0) if relu else out

    lf = jnp.transpose(left_fea, (0, 2, 3, 1))
    wf = jnp.transpose(warp_fea, (0, 2, 3, 1))
    x0 = jnp.concatenate([lf, wf, (cur_disp_map / norm)[..., None]], axis=-1)
    x5 = conv("conv5", x0)
    x6 = conv("conv6", x5, stride=2)
    x7 = conv("conv7", x6)
    x8 = conv("conv8", x6, dil=2)
    x9 = jnp.concatenate([x6, x7, x8], axis=-1)
    x10 = conv("conv10", x9)
    x11 = conv("conv11", x10, stride=2)
    x12 = conv("conv12", x11)
    x13 = conv("conv13", x11, dil=2)
    x14 = jnp.concatenate([x11, x12, x13], axis=-1)
    x15 = conv("conv15", x14)
    x16 = conv("conv16", x14, dil=2)
    x17 = jnp.concatenate([x14, x15, x16], axis=-1)
    x18 = conv("conv18", x17)
    x19 = conv("conv19", x18, stride=2)
    x20 = conv("conv20", x19)
    x21 = conv("conv21", x19, dil=2)
    x22 = jnp.concatenate([x19, x20, x21], axis=-1)
    x23 = conv("conv23", x22)
    x24 = conv("conv24", x22, dil=2)
    x25 = jnp.concatenate([x22, x23, x24], axis=-1)
    x26 = conv("conv26", x25)
    x27 = conv("conv27", x25, dil=2)
    x28 = jnp.concatenate([x25, x26, x27], axis=-1)
    x29 = conv("conv29", x28)
    x30 = conv("conv30", x28, dil=2)
    x31 = jnp.concatenate([x28, x29, x30], axis=-1)
    x32 = conv("conv32", x31)
    x33 = convT("conv33", x32)
    x34 = conv("conv34", x33)
    x35 = jnp.concatenate([x18, x34], axis=-1)
    x36 = convT("conv36", x35)
    x37 = conv("conv37", x36)
    x38 = jnp.concatenate([x10, x37], axis=-1)
    x39 = convT("conv39", x38)
    x40 = conv("conv40", x39)
    x41 = conv("conv41", x40, relu=False)[..., 0]
    return jnp.clip(x41, -ma, ma)


# ----------------------------------------------------------------------------
# Main
# ----------------------------------------------------------------------------
if __name__ == "__main__":
    cfg = {"initial_disp": 4.0, "max_action": 2.0, "max_iteration": 3.0}

    B, C_FEA, H, W = 2, 32, 16, 16
    key = jax.random.PRNGKey(0)
    k_par, k_l, k_w, k_d = jax.random.split(key, 4)

    params = init_params(k_par)
    left_fea = jax.random.normal(k_l, (B, C_FEA, H, W), jnp.float32)
    warp_fea = jax.random.normal(k_w, (B, C_FEA, H, W), jnp.float32)
    cur_disp_map = jax.random.uniform(k_d, (B, H, W), jnp.float32) * 10.0

    roll_sign = _detect_roll_sign()
    names, consts = prepare_kernel_constants(params, B, H, W)
    consts = jax.block_until_ready(consts)        # one-time weight prep (hoisted)

    forward = jax.jit(make_forward(cfg, names, B, H, W, roll_sign))
    out = forward(consts, left_fea, warp_fea, cur_disp_map)
    jax.block_until_ready(out)

    assert out.shape == (B, H, W), out.shape
    assert bool(jnp.all(jnp.isfinite(out)))

    # numerical check against a pure-JAX reference with matched bf16 rounding
    ref = jax.jit(functools.partial(_reference_forward, cfg=cfg))(
        params, left_fea, warp_fea, cur_disp_map)
    err = float(jnp.max(jnp.abs(out - ref)))
    assert err < 2e-2, f"kernel vs reference mismatch: max abs err = {err}"

    print("KERNEL_OK")
</pallas_src>

<mosaic_0001>
module attributes {stable_mosaic.version = 11 : i64} {
  func.func @probe(%arg0: memref<8x128xf32, #tpu.memory_space<vmem>>, %arg1: memref<8x128xf32, #tpu.memory_space<vmem>>) attributes {dimension_semantics = [], scalar_prefetch = 0 : i64, scratch_operands = 0 : i64, tpu.core_type = #tpu.core_type<tc>} {
    %c0 = arith.constant 0 : index
    %c0_0 = arith.constant 0 : index
    %0 = vector.load %arg0[%c0, %c0_0] : memref<8x128xf32, #tpu.memory_space<vmem>>, vector<8x128xf32>
    %c1_i32 = arith.constant 1 : i32
    %1 = tpu.dynamic_rotate %0 by %c1_i32 dim 0 : vector<8x128xf32>, i32 -> vector<8x128xf32>
    %c0_1 = arith.constant 0 : index
    %c0_2 = arith.constant 0 : index
    %2 = vector.load %arg1[%c0_1, %c0_2] : memref<8x128xf32, #tpu.memory_space<vmem>>, vector<8x128xf32>
    tpu.vector_store %arg1[%c0_1, %c0_2], %1 {strides = array<i32>} : memref<8x128xf32, #tpu.memory_space<vmem>>, vector<8x128xf32>,
    return
  }
}

</mosaic_0001>

<bundles_post_ra>
// kernel: tpu_custom_call.1
= control target key start
LH: loop header
LB: loop body
LE: loop exit
PB: predicated region body
PF: predicated region fallthrough
CT: control target
= control target key end

     0   :  { %6 = vsyncpa [#allocation3], 0  ;;  %s125_s0 = inlined_call_operand.hbm [shape: f32[8,128], index: 0, kind: input, shape index: {}]   ;;  %s126_s1 = inlined_call_operand.hbm [shape: f32[8,128], index: 1, kind: output, shape index: {}]  }
   0x1   :  { %7 = vsyncpa [#allocation4], 0  ;;  %s89_s6 = smov [#allocation2]   ;;  %s41_s10 = scalar_lea.hbm %s125_s0, 128 }
   0x2   :  { %s14_s7 = sshll.u32 %s89_s6, 4  ;;  %p42_p0 = scmp.ne.s32.totalorder %s125_s0, %s41_s10  ;;  %s15_s7 = int_to_ptr.vmem [resolvable:$true] %s14_s7 }
   0x3   :  { %p45_p1 = scmp.lt.u32.totalorder %s41_s10, %s125_s0 }
   0x5   :  { %p47_p2 = pnand %p45_p1, %p42_p0 }
   0x7   :  { %50 = shalt.err (!%p47_p2)
}
   0x8   :  { %s51_s15 = scalar_lea.vmem %s15_s7, 128  ;;  %p56_p4 = scmp.lt.s32.totalorder %s15_s7, %s15_s7 }
   0x9   :  { %p52_p3 = scmp.ne.s32.totalorder %s15_s7, %s51_s15  ;;  %p57_p5 = scmp.lt.s32.totalorder %s51_s15, %s51_s15 }
   0xb   :  { %p58_p6 = por %p57_p5, %p56_p4 }
   0xd   :  { %p59_p7 = pnand %p58_p6, %p52_p3 }
   0xf   :  { %62 = shalt.err (!%p59_p7)
}
  0x10   :  { %17 = dma.hbm_to_vmem [thread:$0]  %s125_s0, 128, %s15_s7, [#allocation3]  }
  0x11   :  { %85 = dma.done.wait [#allocation3], 128  }
  0x12   :  { %86 = vsyncadd [#allocation3], 4294967168  ;;  %s90_s18 = smov [#allocation5]   ;;  %v21_v0 = vld [vmem:[#allocation2] sm:$0xff] }
  0x13   :  { %s30_s19 = sshll.u32 %s90_s18, 4  ;;  %v22_v1 = vrot.slane %v21_v0, 7  ;;  %s31_s19 = int_to_ptr.vmem [resolvable:$true] %s30_s19 }
  0x14   :  { %s63_s20 = scalar_lea.vmem %s31_s19, 128  ;;  %p68_p9 = scmp.lt.s32.totalorder %s31_s19, %s31_s19 }
  0x15   :  { %23 = vst [vmem:[#allocation5] sm:$0xff] %v22_v1  ;;  %p64_p8 = scmp.ne.s32.totalorder %s31_s19, %s63_s20  ;;  %p69_p10 = scmp.lt.s32.totalorder %s63_s20, %s63_s20 }
  0x17   :  { %p70_p11 = por %p69_p10, %p68_p9 }
  0x19   :  { %p71_p12 = pnand %p70_p11, %p64_p8 }
  0x1b   :  { %74 = shalt.err (!%p71_p12)
}
  0x1c   :  { %s75_s23 = scalar_lea.hbm %s126_s1, 128 }
  0x1d   :  { %p76_p13 = scmp.ne.s32.totalorder %s126_s1, %s75_s23  ;;  %p79_p0 = scmp.lt.u32.totalorder %s75_s23, %s126_s1 }
  0x1f   :  { %p81_p1 = pnand %p79_p0, %p76_p13 }
  0x21   :  { %84 = shalt.err (!%p81_p1)
}
  0x22   :  { %33 = dma.vmem_to_hbm [thread:$0]  %s31_s19, 128, %s126_s1, [#allocation4]  }
  0x23   :  { %87 = dma.done.wait [#allocation4], 128  }
  0x24   :  { %88 = vsyncadd [#allocation4], 4294967168 }
  0x25   :  { %37 = vsyncpa [#allocation3], 1 }
  0x26   :  { %38 = vsyncpa [#allocation4], 1 }

</bundles_post_ra>
